<compile_context>
chip_gen: v7x
topology: tpu7x:2x2x1
jax: 0.10.0
libtpu: 0.0.40
codegen_flags: <defaults>
</compile_context>

<pallas_src>
import functools

import numpy as np

import jax
import jax.numpy as jnp
from jax.experimental import pallas as pl
from jax.experimental.pallas import tpu as pltpu


# ---------------------------------------------------------------------------
# Kernel
# ---------------------------------------------------------------------------
def _double_conv_kernel(x_ref, t1_ref, b1_ref, t2_ref, b2_ref, o_ref,
                        xp1_ref, xp2_ref, *, H, W, Cin, Cmid, Cout, batch_tile):
    """One grid step = `batch_tile` images.  Fused conv-bn-relu x2.

    x_ref:  (batch_tile*H, W*Cin)   input rows, lane-dense
    t1_ref: (3*W*Cin,  W*Cmid)      layer-1 block-Toeplitz weights (BN folded)
    b1_ref: (1, W*Cmid)             layer-1 bias (tiled per output column)
    t2_ref: (3*W*Cmid, W*Cout)      layer-2 block-Toeplitz weights (BN folded)
    b2_ref: (1, W*Cout)             layer-2 bias (tiled per output column)
    o_ref:  (batch_tile*H, W*Cout)  lane-dense output slab
    xp1_ref: (H+2, W*Cin)  VMEM     row-padded input (halo rows only)
    xp2_ref: (H+2, W*Cmid) VMEM     row-padded mid activation (never leaves VMEM)
    """
    kc1 = W * Cin
    kc2 = W * Cmid

    # Halo-only init: only the top/bottom padding rows need zeros.  The
    # horizontal padding is folded into the Toeplitz weights (zero rows), and
    # the interiors are fully overwritten for every image below.  Done every
    # grid step (not under pl.when) so it stays correct under megacore
    # sharding of the batch axis.
    xp1_ref[0:1, :] = jnp.zeros((1, kc1), jnp.float32)
    xp1_ref[H + 1:H + 2, :] = jnp.zeros((1, kc1), jnp.float32)
    xp2_ref[0:1, :] = jnp.zeros((1, kc2), jnp.float32)
    xp2_ref[H + 1:H + 2, :] = jnp.zeros((1, kc2), jnp.float32)

    def conv_bn_relu(xp_ref, t_ref, b_ref, kc):
        # Sum of 3 row-tap GEMMs; each tap is a plain (H, kc) row-window slice
        # of the padded scratch feeding the MXU directly (no im2col patch, no
        # lane-axis relayout).  Output is directly (H, W*Cout_layer).
        acc = b_ref[...]                                   # (1, W*Cout_layer)
        for dy in range(3):
            acc = acc + jnp.dot(xp_ref[dy:dy + H, :],
                                t_ref[dy * kc:(dy + 1) * kc, :],
                                preferred_element_type=jnp.float32)
        return jnp.maximum(acc, 0.0)                       # (H, W*Cout_layer)

    # Static unroll over the images of this step; scratch interiors are fully
    # rewritten each image, so no re-zeroing is needed.
    for n in range(batch_tile):
        # ---- layer 1 ------------------------------------------------------
        xp1_ref[1:H + 1, :] = x_ref[n * H:(n + 1) * H, :]   # one contiguous store
        y1 = conv_bn_relu(xp1_ref, t1_ref, b1_ref, kc1)      # (H, W*Cmid)

        # ---- layer 2: intermediate never leaves VMEM ----------------------
        xp2_ref[1:H + 1, :] = y1
        y2 = conv_bn_relu(xp2_ref, t2_ref, b2_ref, kc2)      # (H, W*Cout)

        # Lane-dense store (W*Cout == 128 at the demo shape).
        o_ref[n * H:(n + 1) * H, :] = y2.astype(o_ref.dtype)


# ---------------------------------------------------------------------------
# Host-side wrapper
# ---------------------------------------------------------------------------
def double_conv_fused(x_rows, t1, b1, t2, b2, *, N, H, W, Cin, Cmid, Cout):
    """x_rows: (N*H, W*Cin) f32 lane-dense image rows; returns (N*H, W*Cout)."""
    # Fold the whole (small) batch into one grid step; keep a divisor-based
    # tile so larger N still maps onto a 'parallel' grid axis.
    batch_tile = min(N, 8)
    while N % batch_tile:
        batch_tile -= 1
    grid = (N // batch_tile,)

    kernel = functools.partial(_double_conv_kernel, H=H, W=W, Cin=Cin,
                               Cmid=Cmid, Cout=Cout, batch_tile=batch_tile)
    return pl.pallas_call(
        kernel,
        out_shape=jax.ShapeDtypeStruct((N * H, W * Cout), jnp.float32),
        grid_spec=pltpu.PrefetchScalarGridSpec(
            num_scalar_prefetch=0,
            grid=grid,
            in_specs=[
                pl.BlockSpec((batch_tile * H, W * Cin), lambda i: (i, 0)),
                pl.BlockSpec((3 * W * Cin, W * Cmid), lambda i: (0, 0)),
                pl.BlockSpec((1, W * Cmid), lambda i: (0, 0)),
                pl.BlockSpec((3 * W * Cmid, W * Cout), lambda i: (0, 0)),
                pl.BlockSpec((1, W * Cout), lambda i: (0, 0)),
            ],
            out_specs=pl.BlockSpec((batch_tile * H, W * Cout),
                                   lambda i: (i, 0)),
            scratch_shapes=[
                pltpu.VMEM((H + 2, W * Cin), jnp.float32),   # row-padded input
                pltpu.VMEM((H + 2, W * Cmid), jnp.float32),  # row-padded mid act
            ]),
        compiler_params=pltpu.CompilerParams(
            dimension_semantics=("parallel",)),
    )(x_rows, t1, b1, t2, b2)


# ---------------------------------------------------------------------------
# Weight preprocessing (host, one-time): BN fold + block-Toeplitz expansion
# ---------------------------------------------------------------------------
def _fold_bn_into_conv(w, conv_bias, gamma, beta, running_mean, running_var,
                       eps=1e-5):
    """BN(conv(x,w)+b) == conv(x, w*s) + ((b-rm)*s + beta), s=gamma/sqrt(rv+eps)."""
    s = gamma / jnp.sqrt(running_var + eps)
    return w * s[None, None, None, :], (conv_bias - running_mean) * s + beta


def _build_row_toeplitz(w_hwio, W):
    """(3,3,Cin,Cout) conv weights -> (3*W*Cin, W*Cout) row-Toeplitz slab.

    T[dy*W*Cin + xs*Cin + ci, xo*Cout + co] = w[dy, xs-xo+1, ci, co] when
    |xs-xo| <= 1, else 0.  Zero rows for out-of-range taps implement the
    horizontal zero padding, so the kernel needs no padding columns at all.
    """
    _, _, Cin, Cout = w_hwio.shape
    wnp = np.asarray(w_hwio, np.float32)
    T = np.zeros((3 * W * Cin, W * Cout), np.float32)
    for dy in range(3):
        for xo in range(W):
            for dx in range(3):
                xs = xo + dx - 1
                if 0 <= xs < W:
                    T[dy * W * Cin + xs * Cin:dy * W * Cin + (xs + 1) * Cin,
                      xo * Cout:(xo + 1) * Cout] = wnp[dy, dx]
    return jnp.asarray(T)


def _prepare_layer(w_hwio, bias, gamma, beta, rmean, rvar, W):
    w_f, b_f = _fold_bn_into_conv(w_hwio, bias, gamma, beta, rmean, rvar)
    cout = w_hwio.shape[-1]
    T = _build_row_toeplitz(w_f, W)                       # (3*W*Cin, W*Cout)
    b_tiled = jnp.tile(b_f, W).reshape(1, W * cout)       # (1, W*Cout)
    return T, b_tiled


def inconv_forward(x_nchw, params):
    """Forward pass of `inconv(in_ch, out_ch)`. Input/output are NCHW."""
    N, Cin, H, W = x_nchw.shape
    Cout = params["w1"].shape[-1]
    t1, b1 = _prepare_layer(params["w1"], params["b1"], params["g1"],
                            params["beta1"], params["rm1"], params["rv1"], W)
    t2, b2 = _prepare_layer(params["w2"], params["b2"], params["g2"],
                            params["beta2"], params["rm2"], params["rv2"], W)
    # NCHW -> NHWC -> lane-dense (N*H, W*Cin) rows (layout plumbing only).
    x_rows = jnp.transpose(x_nchw, (0, 2, 3, 1)).reshape(N * H, W * Cin)
    y_rows = double_conv_fused(x_rows, t1, b1, t2, b2,
                               N=N, H=H, W=W, Cin=Cin, Cmid=Cout, Cout=Cout)
    return jnp.transpose(y_rows.reshape(N, H, W, Cout), (0, 3, 1, 2))


# ---------------------------------------------------------------------------
# Params / reference / test
# ---------------------------------------------------------------------------
def make_params(key, in_ch, out_ch):
    ks = jax.random.split(key, 12)
    fan1, fan2 = in_ch * 9, out_ch * 9
    bd1, bd2 = 1.0 / (fan1 ** 0.5), 1.0 / (fan2 ** 0.5)
    # conv weights in kernel layout (kh, kw, Cin, Cout)
    w1 = jax.random.uniform(ks[0], (3, 3, in_ch, out_ch), jnp.float32, -bd1, bd1)
    b1 = jax.random.uniform(ks[1], (out_ch,), jnp.float32, -bd1, bd1)
    w2 = jax.random.uniform(ks[2], (3, 3, out_ch, out_ch), jnp.float32, -bd2, bd2)
    b2 = jax.random.uniform(ks[3], (out_ch,), jnp.float32, -bd2, bd2)
    # Non-trivial BN running stats / affine params (eval mode).
    g1 = jax.random.uniform(ks[4], (out_ch,), jnp.float32, 0.5, 1.5)
    g2 = jax.random.uniform(ks[5], (out_ch,), jnp.float32, 0.5, 1.5)
    beta1 = 0.1 * jax.random.normal(ks[6], (out_ch,), jnp.float32)
    beta2 = 0.1 * jax.random.normal(ks[7], (out_ch,), jnp.float32)
    rm1 = 0.1 * jax.random.normal(ks[8], (out_ch,), jnp.float32)
    rm2 = 0.1 * jax.random.normal(ks[9], (out_ch,), jnp.float32)
    rv1 = jax.random.uniform(ks[10], (out_ch,), jnp.float32, 0.5, 1.5)
    rv2 = jax.random.uniform(ks[11], (out_ch,), jnp.float32, 0.5, 1.5)
    return dict(w1=w1, b1=b1, g1=g1, beta1=beta1, rm1=rm1, rv1=rv1,
                w2=w2, b2=b2, g2=g2, beta2=beta2, rm2=rm2, rv2=rv2)


def _reference(x_nchw, params):
    """Pure-JAX reference (XLA conv, eval-mode BN folded) for sanity checking."""
    w1, b1 = _fold_bn_into_conv(params["w1"], params["b1"], params["g1"],
                                params["beta1"], params["rm1"], params["rv1"])
    w2, b2 = _fold_bn_into_conv(params["w2"], params["b2"], params["g2"],
                                params["beta2"], params["rm2"], params["rv2"])

    def conv(x, w, b):
        w_oihw = jnp.transpose(w, (3, 2, 0, 1))
        y = jax.lax.conv_general_dilated(
            x, w_oihw, window_strides=(1, 1), padding="SAME",
            dimension_numbers=("NCHW", "OIHW", "NCHW"))
        return jnp.maximum(y + b[None, :, None, None], 0.0)

    return conv(conv(x_nchw, w1, b1), w2, b2)


if __name__ == "__main__":
    key = jax.random.PRNGKey(0)
    kx, kp = jax.random.split(key)

    N, in_ch, out_ch, H, W = 2, 4, 8, 16, 16
    x = jax.random.normal(kx, (N, in_ch, H, W), jnp.float32)   # NCHW, as PyTorch
    params = make_params(kp, in_ch, out_ch)

    out = jax.block_until_ready(inconv_forward(x, params))
    assert out.shape == (N, out_ch, H, W), out.shape

    ref = jax.block_until_ready(_reference(x, params))
    err = float(jnp.max(jnp.abs(out - ref)))
    assert jnp.allclose(out, ref, atol=1e-3, rtol=1e-3), err

    print("KERNEL_OK")
</pallas_src>

<mosaic_0001>
module attributes {stable_mosaic.version = 11 : i64} {
  func.func @_double_conv_kernel(%arg0: i32, %arg1: memref<32x64xf32, #tpu.memory_space<vmem>>, %arg2: memref<192x128xf32, #tpu.memory_space<vmem>>, %arg3: memref<1x128xf32, #tpu.memory_space<vmem>>, %arg4: memref<384x128xf32, #tpu.memory_space<vmem>>, %arg5: memref<1x128xf32, #tpu.memory_space<vmem>>, %arg6: memref<32x128xf32, #tpu.memory_space<vmem>>, %arg7: memref<18x64xf32, #tpu.memory_space<vmem>>, %arg8: memref<18x128xf32, #tpu.memory_space<vmem>>) attributes {dimension_semantics = [#tpu.dimension_semantics<parallel>], iteration_bounds = array<i64: 1>, scalar_prefetch = 0 : i64, scratch_operands = 2 : i64, tpu.core_type = #tpu.core_type<tc>, window_params = [{transform_indices = @transform_0, window_bounds = array<i64: 32, 64>}, {pipeline_mode = #tpu.pipeline_mode<synchronous>, transform_indices = @transform_1, window_bounds = array<i64: 192, 128>}, {pipeline_mode = #tpu.pipeline_mode<synchronous>, transform_indices = @transform_2, window_bounds = array<i64: 1, 128>}, {pipeline_mode = #tpu.pipeline_mode<synchronous>, transform_indices = @transform_3, window_bounds = array<i64: 384, 128>}, {pipeline_mode = #tpu.pipeline_mode<synchronous>, transform_indices = @transform_4, window_bounds = array<i64: 1, 128>}, {transform_indices = @transform_5, window_bounds = array<i64: 32, 128>}]} {
    %cst = arith.constant 0.000000e+00 : f32
    %0 = vector.broadcast %cst : f32 to vector<1x64xf32>
    %c0 = arith.constant 0 : index
    %c0_0 = arith.constant 0 : index
    %1 = vector.load %arg7[%c0, %c0_0] : memref<18x64xf32, #tpu.memory_space<vmem>>, vector<1x64xf32>
    tpu.vector_store %arg7[%c0, %c0_0], %0 {strides = array<i32>} : memref<18x64xf32, #tpu.memory_space<vmem>>, vector<1x64xf32>,
    %cst_1 = arith.constant 0.000000e+00 : f32
    %2 = vector.broadcast %cst_1 : f32 to vector<1x64xf32>
    %c17 = arith.constant 17 : index
    %c0_2 = arith.constant 0 : index
    %3 = vector.load %arg7[%c17, %c0_2] : memref<18x64xf32, #tpu.memory_space<vmem>>, vector<1x64xf32>
    tpu.vector_store %arg7[%c17, %c0_2], %2 {strides = array<i32>} : memref<18x64xf32, #tpu.memory_space<vmem>>, vector<1x64xf32>,
    %cst_3 = arith.constant 0.000000e+00 : f32
    %4 = vector.broadcast %cst_3 : f32 to vector<1x128xf32>
    %c0_4 = arith.constant 0 : index
    %c0_5 = arith.constant 0 : index
    %5 = vector.load %arg8[%c0_4, %c0_5] : memref<18x128xf32, #tpu.memory_space<vmem>>, vector<1x128xf32>
    tpu.vector_store %arg8[%c0_4, %c0_5], %4 {strides = array<i32>} : memref<18x128xf32, #tpu.memory_space<vmem>>, vector<1x128xf32>,
    %cst_6 = arith.constant 0.000000e+00 : f32
    %6 = vector.broadcast %cst_6 : f32 to vector<1x128xf32>
    %c17_7 = arith.constant 17 : index
    %c0_8 = arith.constant 0 : index
    %7 = vector.load %arg8[%c17_7, %c0_8] : memref<18x128xf32, #tpu.memory_space<vmem>>, vector<1x128xf32>
    tpu.vector_store %arg8[%c17_7, %c0_8], %6 {strides = array<i32>} : memref<18x128xf32, #tpu.memory_space<vmem>>, vector<1x128xf32>,
    %c0_9 = arith.constant 0 : index
    %c0_10 = arith.constant 0 : index
    %8 = vector.load %arg1[%c0_9, %c0_10] : memref<32x64xf32, #tpu.memory_space<vmem>>, vector<16x64xf32>
    %c1 = arith.constant 1 : index
    %c0_11 = arith.constant 0 : index
    %9 = vector.load %arg7[%c1, %c0_11] : memref<18x64xf32, #tpu.memory_space<vmem>>, vector<16x64xf32>
    tpu.vector_store %arg7[%c1, %c0_11], %8 {strides = array<i32>} : memref<18x64xf32, #tpu.memory_space<vmem>>, vector<16x64xf32>,
    %c0_12 = arith.constant 0 : index
    %c0_13 = arith.constant 0 : index
    %10 = vector.load %arg3[%c0_12, %c0_13] : memref<1x128xf32, #tpu.memory_space<vmem>>, vector<1x128xf32>
    %c0_14 = arith.constant 0 : index
    %c0_15 = arith.constant 0 : index
    %11 = vector.load %arg7[%c0_14, %c0_15] : memref<18x64xf32, #tpu.memory_space<vmem>>, vector<16x64xf32>
    %c0_16 = arith.constant 0 : index
    %c0_17 = arith.constant 0 : index
    %12 = vector.load %arg2[%c0_16, %c0_17] : memref<192x128xf32, #tpu.memory_space<vmem>>, vector<64x128xf32>
    %cst_18 = arith.constant dense<0.000000e+00> : vector<16x128xf32>
    %13 = tpu.matmul %11, %12, %cst_18 {dimension_numbers = #tpu.dot_dimension_numbers<[1], [0], [0], [1], [0, 0, 1, 1], [], []>} : vector<16x64xf32>, vector<64x128xf32>, vector<16x128xf32> -> vector<16x128xf32>
    %14 = vector.broadcast %10 : vector<1x128xf32> to vector<16x128xf32>
    %15 = arith.addf %14, %13 : vector<16x128xf32>
    %c1_19 = arith.constant 1 : index
    %c0_20 = arith.constant 0 : index
    %16 = vector.load %arg7[%c1_19, %c0_20] : memref<18x64xf32, #tpu.memory_space<vmem>>, vector<16x64xf32>
    %c64 = arith.constant 64 : index
    %c0_21 = arith.constant 0 : index
    %17 = vector.load %arg2[%c64, %c0_21] : memref<192x128xf32, #tpu.memory_space<vmem>>, vector<64x128xf32>
    %cst_22 = arith.constant dense<0.000000e+00> : vector<16x128xf32>
    %18 = tpu.matmul %16, %17, %cst_22 {dimension_numbers = #tpu.dot_dimension_numbers<[1], [0], [0], [1], [0, 0, 1, 1], [], []>} : vector<16x64xf32>, vector<64x128xf32>, vector<16x128xf32> -> vector<16x128xf32>
    %19 = arith.addf %15, %18 : vector<16x128xf32>
    %c2 = arith.constant 2 : index
    %c0_23 = arith.constant 0 : index
    %20 = vector.load %arg7[%c2, %c0_23] : memref<18x64xf32, #tpu.memory_space<vmem>>, vector<16x64xf32>
    %c128 = arith.constant 128 : index
    %c0_24 = arith.constant 0 : index
    %21 = vector.load %arg2[%c128, %c0_24] : memref<192x128xf32, #tpu.memory_space<vmem>>, vector<64x128xf32>
    %cst_25 = arith.constant dense<0.000000e+00> : vector<16x128xf32>
    %22 = tpu.matmul %20, %21, %cst_25 {dimension_numbers = #tpu.dot_dimension_numbers<[1], [0], [0], [1], [0, 0, 1, 1], [], []>} : vector<16x64xf32>, vector<64x128xf32>, vector<16x128xf32> -> vector<16x128xf32>
    %23 = arith.addf %19, %22 : vector<16x128xf32>
    %cst_26 = arith.constant 0.000000e+00 : f32
    %24 = vector.broadcast %cst_26 : f32 to vector<16x128xf32>
    %25 = arith.maximumf %23, %24 : vector<16x128xf32>
    %c1_27 = arith.constant 1 : index
    %c0_28 = arith.constant 0 : index
    %26 = vector.load %arg8[%c1_27, %c0_28] : memref<18x128xf32, #tpu.memory_space<vmem>>, vector<16x128xf32>
    tpu.vector_store %arg8[%c1_27, %c0_28], %25 {strides = array<i32>} : memref<18x128xf32, #tpu.memory_space<vmem>>, vector<16x128xf32>,
    %c0_29 = arith.constant 0 : index
    %c0_30 = arith.constant 0 : index
    %27 = vector.load %arg5[%c0_29, %c0_30] : memref<1x128xf32, #tpu.memory_space<vmem>>, vector<1x128xf32>
    %c0_31 = arith.constant 0 : index
    %c0_32 = arith.constant 0 : index
    %28 = vector.load %arg8[%c0_31, %c0_32] : memref<18x128xf32, #tpu.memory_space<vmem>>, vector<16x128xf32>
    %c0_33 = arith.constant 0 : index
    %c0_34 = arith.constant 0 : index
    %29 = vector.load %arg4[%c0_33, %c0_34] : memref<384x128xf32, #tpu.memory_space<vmem>>, vector<128x128xf32>
    %cst_35 = arith.constant dense<0.000000e+00> : vector<16x128xf32>
    %30 = tpu.matmul %28, %29, %cst_35 {dimension_numbers = #tpu.dot_dimension_numbers<[1], [0], [0], [1], [0, 0, 1, 1], [], []>} : vector<16x128xf32>, vector<128x128xf32>, vector<16x128xf32> -> vector<16x128xf32>
    %31 = vector.broadcast %27 : vector<1x128xf32> to vector<16x128xf32>
    %32 = arith.addf %31, %30 : vector<16x128xf32>
    %c1_36 = arith.constant 1 : index
    %c0_37 = arith.constant 0 : index
    %33 = vector.load %arg8[%c1_36, %c0_37] : memref<18x128xf32, #tpu.memory_space<vmem>>, vector<16x128xf32>
    %c128_38 = arith.constant 128 : index
    %c0_39 = arith.constant 0 : index
    %34 = vector.load %arg4[%c128_38, %c0_39] : memref<384x128xf32, #tpu.memory_space<vmem>>, vector<128x128xf32>
    %cst_40 = arith.constant dense<0.000000e+00> : vector<16x128xf32>
    %35 = tpu.matmul %33, %34, %cst_40 {dimension_numbers = #tpu.dot_dimension_numbers<[1], [0], [0], [1], [0, 0, 1, 1], [], []>} : vector<16x128xf32>, vector<128x128xf32>, vector<16x128xf32> -> vector<16x128xf32>
    %36 = arith.addf %32, %35 : vector<16x128xf32>
    %c2_41 = arith.constant 2 : index
    %c0_42 = arith.constant 0 : index
    %37 = vector.load %arg8[%c2_41, %c0_42] : memref<18x128xf32, #tpu.memory_space<vmem>>, vector<16x128xf32>
    %c256 = arith.constant 256 : index
    %c0_43 = arith.constant 0 : index
    %38 = vector.load %arg4[%c256, %c0_43] : memref<384x128xf32, #tpu.memory_space<vmem>>, vector<128x128xf32>
    %cst_44 = arith.constant dense<0.000000e+00> : vector<16x128xf32>
    %39 = tpu.matmul %37, %38, %cst_44 {dimension_numbers = #tpu.dot_dimension_numbers<[1], [0], [0], [1], [0, 0, 1, 1], [], []>} : vector<16x128xf32>, vector<128x128xf32>, vector<16x128xf32> -> vector<16x128xf32>
    %40 = arith.addf %36, %39 : vector<16x128xf32>
    %cst_45 = arith.constant 0.000000e+00 : f32
    %41 = vector.broadcast %cst_45 : f32 to vector<16x128xf32>
    %42 = arith.maximumf %40, %41 : vector<16x128xf32>
    %c0_46 = arith.constant 0 : index
    %c0_47 = arith.constant 0 : index
    %43 = vector.load %arg6[%c0_46, %c0_47] : memref<32x128xf32, #tpu.memory_space<vmem>>, vector<16x128xf32>
    tpu.vector_store %arg6[%c0_46, %c0_47], %42 {strides = array<i32>} : memref<32x128xf32, #tpu.memory_space<vmem>>, vector<16x128xf32>,
    %c16 = arith.constant 16 : index
    %c0_48 = arith.constant 0 : index
    %44 = vector.load %arg1[%c16, %c0_48] : memref<32x64xf32, #tpu.memory_space<vmem>>, vector<16x64xf32>
    %c1_49 = arith.constant 1 : index
    %c0_50 = arith.constant 0 : index
    %45 = vector.load %arg7[%c1_49, %c0_50] : memref<18x64xf32, #tpu.memory_space<vmem>>, vector<16x64xf32>
    tpu.vector_store %arg7[%c1_49, %c0_50], %44 {strides = array<i32>} : memref<18x64xf32, #tpu.memory_space<vmem>>, vector<16x64xf32>,
    %c0_51 = arith.constant 0 : index
    %c0_52 = arith.constant 0 : index
    %46 = vector.load %arg3[%c0_51, %c0_52] : memref<1x128xf32, #tpu.memory_space<vmem>>, vector<1x128xf32>
    %c0_53 = arith.constant 0 : index
    %c0_54 = arith.constant 0 : index
    %47 = vector.load %arg7[%c0_53, %c0_54] : memref<18x64xf32, #tpu.memory_space<vmem>>, vector<16x64xf32>
    %c0_55 = arith.constant 0 : index
    %c0_56 = arith.constant 0 : index
    %48 = vector.load %arg2[%c0_55, %c0_56] : memref<192x128xf32, #tpu.memory_space<vmem>>, vector<64x128xf32>
    %cst_57 = arith.constant dense<0.000000e+00> : vector<16x128xf32>
    %49 = tpu.matmul %47, %48, %cst_57 {dimension_numbers = #tpu.dot_dimension_numbers<[1], [0], [0], [1], [0, 0, 1, 1], [], []>} : vector<16x64xf32>, vector<64x128xf32>, vector<16x128xf32> -> vector<16x128xf32>
    %50 = vector.broadcast %46 : vector<1x128xf32> to vector<16x128xf32>
    %51 = arith.addf %50, %49 : vector<16x128xf32>
    %c1_58 = arith.constant 1 : index
    %c0_59 = arith.constant 0 : index
    %52 = vector.load %arg7[%c1_58, %c0_59] : memref<18x64xf32, #tpu.memory_space<vmem>>, vector<16x64xf32>
    %c64_60 = arith.constant 64 : index
    %c0_61 = arith.constant 0 : index
    %53 = vector.load %arg2[%c64_60, %c0_61] : memref<192x128xf32, #tpu.memory_space<vmem>>, vector<64x128xf32>
    %cst_62 = arith.constant dense<0.000000e+00> : vector<16x128xf32>
    %54 = tpu.matmul %52, %53, %cst_62 {dimension_numbers = #tpu.dot_dimension_numbers<[1], [0], [0], [1], [0, 0, 1, 1], [], []>} : vector<16x64xf32>, vector<64x128xf32>, vector<16x128xf32> -> vector<16x128xf32>
    %55 = arith.addf %51, %54 : vector<16x128xf32>
    %c2_63 = arith.constant 2 : index
    %c0_64 = arith.constant 0 : index
    %56 = vector.load %arg7[%c2_63, %c0_64] : memref<18x64xf32, #tpu.memory_space<vmem>>, vector<16x64xf32>
    %c128_65 = arith.constant 128 : index
    %c0_66 = arith.constant 0 : index
    %57 = vector.load %arg2[%c128_65, %c0_66] : memref<192x128xf32, #tpu.memory_space<vmem>>, vector<64x128xf32>
    %cst_67 = arith.constant dense<0.000000e+00> : vector<16x128xf32>
    %58 = tpu.matmul %56, %57, %cst_67 {dimension_numbers = #tpu.dot_dimension_numbers<[1], [0], [0], [1], [0, 0, 1, 1], [], []>} : vector<16x64xf32>, vector<64x128xf32>, vector<16x128xf32> -> vector<16x128xf32>
    %59 = arith.addf %55, %58 : vector<16x128xf32>
    %cst_68 = arith.constant 0.000000e+00 : f32
    %60 = vector.broadcast %cst_68 : f32 to vector<16x128xf32>
    %61 = arith.maximumf %59, %60 : vector<16x128xf32>
    %c1_69 = arith.constant 1 : index
    %c0_70 = arith.constant 0 : index
    %62 = vector.load %arg8[%c1_69, %c0_70] : memref<18x128xf32, #tpu.memory_space<vmem>>, vector<16x128xf32>
    tpu.vector_store %arg8[%c1_69, %c0_70], %61 {strides = array<i32>} : memref<18x128xf32, #tpu.memory_space<vmem>>, vector<16x128xf32>,
    %c0_71 = arith.constant 0 : index
    %c0_72 = arith.constant 0 : index
    %63 = vector.load %arg5[%c0_71, %c0_72] : memref<1x128xf32, #tpu.memory_space<vmem>>, vector<1x128xf32>
    %c0_73 = arith.constant 0 : index
    %c0_74 = arith.constant 0 : index
    %64 = vector.load %arg8[%c0_73, %c0_74] : memref<18x128xf32, #tpu.memory_space<vmem>>, vector<16x128xf32>
    %c0_75 = arith.constant 0 : index
    %c0_76 = arith.constant 0 : index
    %65 = vector.load %arg4[%c0_75, %c0_76] : memref<384x128xf32, #tpu.memory_space<vmem>>, vector<128x128xf32>
    %cst_77 = arith.constant dense<0.000000e+00> : vector<16x128xf32>
    %66 = tpu.matmul %64, %65, %cst_77 {dimension_numbers = #tpu.dot_dimension_numbers<[1], [0], [0], [1], [0, 0, 1, 1], [], []>} : vector<16x128xf32>, vector<128x128xf32>, vector<16x128xf32> -> vector<16x128xf32>
    %67 = vector.broadcast %63 : vector<1x128xf32> to vector<16x128xf32>
    %68 = arith.addf %67, %66 : vector<16x128xf32>
    %c1_78 = arith.constant 1 : index
    %c0_79 = arith.constant 0 : index
    %69 = vector.load %arg8[%c1_78, %c0_79] : memref<18x128xf32, #tpu.memory_space<vmem>>, vector<16x128xf32>
    %c128_80 = arith.constant 128 : index
    %c0_81 = arith.constant 0 : index
    %70 = vector.load %arg4[%c128_80, %c0_81] : memref<384x128xf32, #tpu.memory_space<vmem>>, vector<128x128xf32>
    %cst_82 = arith.constant dense<0.000000e+00> : vector<16x128xf32>
    %71 = tpu.matmul %69, %70, %cst_82 {dimension_numbers = #tpu.dot_dimension_numbers<[1], [0], [0], [1], [0, 0, 1, 1], [], []>} : vector<16x128xf32>, vector<128x128xf32>, vector<16x128xf32> -> vector<16x128xf32>
    %72 = arith.addf %68, %71 : vector<16x128xf32>
    %c2_83 = arith.constant 2 : index
    %c0_84 = arith.constant 0 : index
    %73 = vector.load %arg8[%c2_83, %c0_84] : memref<18x128xf32, #tpu.memory_space<vmem>>, vector<16x128xf32>
    %c256_85 = arith.constant 256 : index
    %c0_86 = arith.constant 0 : index
    %74 = vector.load %arg4[%c256_85, %c0_86] : memref<384x128xf32, #tpu.memory_space<vmem>>, vector<128x128xf32>
    %cst_87 = arith.constant dense<0.000000e+00> : vector<16x128xf32>
    %75 = tpu.matmul %73, %74, %cst_87 {dimension_numbers = #tpu.dot_dimension_numbers<[1], [0], [0], [1], [0, 0, 1, 1], [], []>} : vector<16x128xf32>, vector<128x128xf32>, vector<16x128xf32> -> vector<16x128xf32>
    %76 = arith.addf %72, %75 : vector<16x128xf32>
    %cst_88 = arith.constant 0.000000e+00 : f32
    %77 = vector.broadcast %cst_88 : f32 to vector<16x128xf32>
    %78 = arith.maximumf %76, %77 : vector<16x128xf32>
    %c16_89 = arith.constant 16 : index
    %c0_90 = arith.constant 0 : index
    %79 = vector.load %arg6[%c16_89, %c0_90] : memref<32x128xf32, #tpu.memory_space<vmem>>, vector<16x128xf32>
    tpu.vector_store %arg6[%c16_89, %c0_90], %78 {strides = array<i32>} : memref<32x128xf32, #tpu.memory_space<vmem>>, vector<16x128xf32>,
    return
  }
  func.func @transform_0(%arg0: i32) -> (i32, i32) {
    %c0_i32 = arith.constant 0 : i32
    %c0_i32_0 = arith.constant 0 : i32
    return %arg0, %c0_i32 : i32, i32
  }
  func.func @transform_1(%arg0: i32) -> (i32, i32) {
    %c0_i32 = arith.constant 0 : i32
    %c0_i32_0 = arith.constant 0 : i32
    %c0_i32_1 = arith.constant 0 : i32
    return %c0_i32, %c0_i32_0 : i32, i32
  }
  func.func @transform_2(%arg0: i32) -> (i32, i32) {
    %c0_i32 = arith.constant 0 : i32
    %c0_i32_0 = arith.constant 0 : i32
    %c0_i32_1 = arith.constant 0 : i32
    return %c0_i32, %c0_i32_0 : i32, i32
  }
  func.func @transform_3(%arg0: i32) -> (i32, i32) {
    %c0_i32 = arith.constant 0 : i32
    %c0_i32_0 = arith.constant 0 : i32
    %c0_i32_1 = arith.constant 0 : i32
    return %c0_i32, %c0_i32_0 : i32, i32
  }
  func.func @transform_4(%arg0: i32) -> (i32, i32) {
    %c0_i32 = arith.constant 0 : i32
    %c0_i32_0 = arith.constant 0 : i32
    %c0_i32_1 = arith.constant 0 : i32
    return %c0_i32, %c0_i32_0 : i32, i32
  }
  func.func @transform_5(%arg0: i32) -> (i32, i32) {
    %c0_i32 = arith.constant 0 : i32
    %c0_i32_0 = arith.constant 0 : i32
    return %arg0, %c0_i32 : i32, i32
  }
}

</mosaic_0001>

<bundles_post_ra>
// kernel: tpu_custom_call.1
= control target key start
LH: loop header
LB: loop body
LE: loop exit
PB: predicated region body
PF: predicated region fallthrough
CT: control target
= control target key end

     0   :  { %10 = vsyncpa [#allocation5], 0  ;;  %s2427_s0 = inlined_call_operand.hbm [shape: f32[32,64], index: 0, kind: input, shape index: {}]   ;;  %s2428_s1 = inlined_call_operand.hbm [shape: f32[192,128], index: 1, kind: input, shape index: {}]   ;;  %s2429_s2 = inlined_call_operand.vmem [shape: f32[1,128], index: 2, kind: input, shape index: {}]   ;;  %s2430_s3 = inlined_call_operand.hbm [shape: f32[384,128], index: 3, kind: input, shape index: {}]   ;;  %s2431_s4 = inlined_call_operand.vmem [shape: f32[1,128], index: 4, kind: input, shape index: {}]   ;;  %s2432_s5 = inlined_call_operand.hbm [shape: f32[32,128], index: 5, kind: output, shape index: {}]  }
   0x1   :  { %11 = vsyncpa [#allocation8], 0 }
   0x2   :  { %12 = vsyncpa [#allocation6], 0  ;;  %s2187_s18 = smov [#allocation7]   ;;  %s2188_s20 = smov [#allocation4]  }
   0x3   :  { %s30_s19 = sshll.u32 %s2187_s18, 4  ;;  %s18_s21 = sshll.u32 %s2188_s20, 4  ;;  %s31_s19 = int_to_ptr.vmem [resolvable:$true] %s30_s19  ;;  %s2224_s21 = int_to_ptr.vmem [resolvable:$true] %s18_s21 }
   0x4   :  { %s2093_s24 = scalar_lea.hbm %s2428_s1, 3072 }
   0x5   :  { %p2094_p0 = scmp.ne.s32.totalorder %s2428_s1, %s2093_s24  ;;  %p2097_p1 = scmp.lt.u32.totalorder %s2093_s24, %s2428_s1 }
   0x7   :  { %p2099_p2 = pnand %p2097_p1, %p2094_p0 }
   0x9   :  { %2102 = shalt.err (!%p2099_p2)
}
   0xa   :  { %s2103_s29 = scalar_lea.vmem %s31_s19, 3072  ;;  %p2108_p4 = scmp.lt.s32.totalorder %s31_s19, %s31_s19 }
   0xb   :  { %p2104_p3 = scmp.ne.s32.totalorder %s31_s19, %s2103_s29  ;;  %p2109_p5 = scmp.lt.s32.totalorder %s2103_s29, %s2103_s29 }
   0xd   :  { %p2110_p6 = por %p2109_p5, %p2108_p4 }
   0xf   :  { %p2111_p7 = pnand %p2110_p6, %p2104_p3 }
  0x11   :  { %2114 = shalt.err (!%p2111_p7)
}
  0x12   :  { %s2189_s30 = smov 128   ;;  %s2190_s6 = smov 8  }
  0x13   :  { %36 = dma.hbm_to_vmem [thread:$0]  %s2428_s1, 3072, %s31_s19, [#allocation8], %s2189_s30, %s2189_s30, %s2190_s6  }
  0x14   :  { %s2115_s11 = scalar_lea.hbm %s2427_s0, 512 }
  0x15   :  { %p2116_p8 = scmp.ne.s32.totalorder %s2427_s0, %s2115_s11  ;;  %p2119_p9 = scmp.lt.u32.totalorder %s2115_s11, %s2427_s0 }
  0x17   :  { %p2121_p10 = pnand %p2119_p9, %p2116_p8 }
  0x19   :  { %2124 = shalt.err (!%p2121_p10)
}
  0x1a   :  { %s2125_s16 = scalar_lea.vmem %s2224_s21, 512  ;;  %p2130_p12 = scmp.lt.s32.totalorder %s2224_s21, %s2224_s21 }
  0x1b   :  { %p2126_p11 = scmp.ne.s32.totalorder %s2224_s21, %s2125_s16  ;;  %p2131_p13 = scmp.lt.s32.totalorder %s2125_s16, %s2125_s16 }
  0x1d   :  { %p2132_p0 = por %p2131_p13, %p2130_p12 }
  0x1f   :  { %p2133_p1 = pnand %p2132_p0, %p2126_p11 }
  0x21   :  { %2136 = shalt.err (!%p2133_p1)
}
  0x22   :  { %24 = dma.hbm_to_vmem [thread:$0]  %s2427_s0, 512, %s2224_s21, [#allocation5], %s2189_s30, %s2189_s30, %s2190_s6  }
  0x23   :  { %s2191_s18 = smov [#allocation9]   ;;  %s2137_s23 = scalar_lea.hbm %s2430_s3, 6144 }
  0x24   :  { %s44_s19 = sshll.u32 %s2191_s18, 4  ;;  %p2138_p2 = scmp.ne.s32.totalorder %s2430_s3, %s2137_s23  ;;  %s45_s19 = int_to_ptr.vmem [resolvable:$true] %s44_s19 }
  0x25   :  { %p2141_p3 = scmp.lt.u32.totalorder %s2137_s23, %s2430_s3 }
  0x27   :  { %p2143_p4 = pnand %p2141_p3, %p2138_p2 }
  0x29   :  { %2146 = shalt.err (!%p2143_p4)
}
  0x2a   :  { %s2147_s28 = scalar_lea.vmem %s45_s19, 6144  ;;  %p2152_p6 = scmp.lt.s32.totalorder %s45_s19, %s45_s19 }
  0x2b   :  { %p2148_p5 = scmp.ne.s32.totalorder %s45_s19, %s2147_s28  ;;  %p2153_p7 = scmp.lt.s32.totalorder %s2147_s28, %s2147_s28 }
  0x2d   :  { %p2154_p8 = por %p2153_p7, %p2152_p6 }
  0x2f   :  { %p2155_p9 = pnand %p2154_p8, %p2148_p5 }
  0x31   :  { %2158 = shalt.err (!%p2155_p9)
}
  0x32   :  { %50 = dma.hbm_to_vmem [thread:$0]  %s2430_s3, 6144, %s45_s19, [#allocation8], %s2189_s30, %s2189_s30, %s2190_s6  }
  0x33   :  { %2181 = dma.done.wait [#allocation5], 512  }
  0x34   :  { %2182 = vsyncadd [#allocation5], 4294966784 }
  0x35   :  { %2183 = dma.done.wait [#allocation8], 9216  }
  0x36   :  { %2184 = vsyncadd [#allocation8], 4294958080  ;;  %vm62_vm0 = vcmask 516096   ;;  %v2192_v0 = vmov 0.0   ;;  %v174_v1 = vld [vmem:[#allocation7 + $0x40] sm:$0xff]  ;;  %v175_v2 = vld [vmem:[#allocation7 + $0x48] sm:$0xff] }
  0x37   :  { %63 = vst.msk [vmem:[#allocation2] sm:$0x1] %vm62_vm0, %v2192_v0  ;;  %64 = vst.msk [vmem:[#allocation2 + $0x11] sm:$0x1] %vm62_vm0, %v2192_v0  ;;  %v176_v3 = vld [vmem:[#allocation7 + $0x50] sm:$0xff]  ;;  %v2276_v4 = vpack.c.bf16 %v175_v2, %v174_v1  ;;  %v177_v5 = vld [vmem:[#allocation7 + $0x58] sm:$0xff] }
  0x38   :  { %66 = vst [vmem:[#allocation3 + $0x11] sm:$0x1] %v2192_v0  ;;  %65 = vst [vmem:[#allocation3] sm:$0x1] %v2192_v0  ;;  %vm69_vm1 = vcmask 523264   ;;  %v2278_v6 = vpack.c.bf16 %v177_v5, %v176_v3  ;;  %v178_v7 = vld [vmem:[#allocation7 + $0x60] sm:$0xff] }
  0x39   :  { %v179_v8 = vld [vmem:[#allocation7 + $0x68] sm:$0xff]  ;;  %v75_v9 = vld [vmem:[#allocation7] sm:$0xff]  ;;  %1791 = vmatprep.subr.bf16.mxu0 %v2276_v4  ;;  %v77_v13 = vld [vmem:[#allocation7 + $0x10] sm:$0xff]  ;;  %s2193_s8 = smov [#allocation10]  }
  0x3a   :  { %v76_v10 = vld [vmem:[#allocation7 + $0x8] sm:$0xff]  ;;  %v67_v11 = vld [vmem:[#allocation4] sm:$0xff]  ;;  %1793 = vmatpush3.bf16.msra.mxu0 %v2276_v4  ;;  %v78_v14 = vld [vmem:[#allocation7 + $0x18] sm:$0xff]  ;;  %v2286_v15 = vpack.c.bf16 %v179_v8, %v178_v7  ;;  %s1253_s9 = sshll.u32 %s2193_s8, 4  ;;  %s1254_s9 = int_to_ptr.vmem [resolvable:$true] %s1253_s9 }
  0x3b   :  { %v2282_v12 = vpack.c.bf16 %v76_v10, %v75_v9  ;;  %70 = vst.msk [vmem:[#allocation2 + $0x1] sm:$0xff] %vm69_vm1, %v67_v11  ;;  %1795 = vmatprep.subr.bf16.mxu0 %v2278_v6  ;;  %v180_v16 = vld [vmem:[#allocation7 + $0x70] sm:$0xff]  ;;  %v2288_v17 = vpack.c.bf16 %v78_v14, %v77_v13  ;;  %v68_v18 = vld [vmem:[#allocation4 + $0x8] sm:$0xff]  ;;  %v181_v19 = vld [vmem:[#allocation7 + $0x78] sm:$0xff]  ;;  %p2164_p11 = scmp.lt.s32.totalorder %s1254_s9, %s1254_s9 }
  0x3c   :  { %71 = vst.msk [vmem:[#allocation2 + $0x9] sm:$0xff] %vm69_vm1, %v68_v18  ;;  %v79_v20 = vld [vmem:[#allocation7 + $0x20] sm:$0xff]  ;;  %v80_v21 = vld [vmem:[#allocation7 + $0x28] sm:$0xff]  ;;  %v2296_v22 = vpack.c.bf16 %v181_v19, %v180_v16  ;;  %v81_v24 = vld [vmem:[#allocation7 + $0x30] sm:$0xff] }
  0x3d   :  { %1775 = vmatprep.subr.bf16.mxu1 %v2282_v12  ;;  %v2298_v23 = vpack.c.bf16 %v80_v21, %v79_v20  ;;  %v82_v25 = vld [vmem:[#allocation7 + $0x38] sm:$0xff]  ;;  %v267_v26 = vld [vmem:[#allocation7 + $0x80] sm:$0xff]  ;;  %v268_v27 = vld [vmem:[#allocation7 + $0x88] sm:$0xff] }
  0x3e   :  { %1777 = vmatpush3.bf16.msra.mxu1 %v2282_v12  ;;  %1797 = vmatpush3.bf16.msra.mxu0 %v2278_v6  ;;  %v658_v30 = vld [vmem:[#allocation4 + $0x10] sm:$0xff]  ;;  %v270_v32 = vld [vmem:[#allocation7 + $0x98] sm:$0xff]  ;;  %v2303_v33 = vpack.c.bf16 %v82_v25, %v81_v24  ;;  %v2306_v35 = vpack.c.bf16 %v268_v27, %v267_v26  ;;  %v365_v38 = vld [vmem:[#allocation9] sm:$0xff] }
  0x3f   :  { %1779 = vmatprep.subr.bf16.mxu1 %v2288_v17  ;;  %1799 = vmatprep.subr.bf16.mxu0 %v2286_v15  ;;  %v269_v31 = vld [vmem:[#allocation7 + $0x90] sm:$0xff]  ;;  %v659_v34 = vld [vmem:[#allocation4 + $0x18] sm:$0xff]  ;;  %v366_v41 = vld [vmem:[#allocation9 + $0x8] sm:$0xff] }
  0x40   :  { %v2316_v42 = vpack.c.bf16 %v270_v32, %v269_v31  ;;  %v2318_v43 = vpack.c.bf16 %v366_v41, %v365_v38  ;;  %v367_v44 = vld [vmem:[#allocation9 + $0x10] sm:$0xff]  ;;  %v368_v45 = vld [vmem:[#allocation9 + $0x18] sm:$0xff]  ;;  %v271_v46 = vld [vmem:[#allocation7 + $0xa0] sm:$0xff] }
  0x41   :  { %v272_v47 = vld [vmem:[#allocation7 + $0xa8] sm:$0xff]  ;;  %v2324_v48 = vpack.c.bf16 %v368_v45, %v367_v44  ;;  %v369_v50 = vld [vmem:[#allocation9 + $0x20] sm:$0xff]  ;;  %v273_v52 = vld [vmem:[#allocation7 + $0xb0] sm:$0xff] }
  0x42   :  { %v172_v28 = vld [vmem:[#allocation2 + $0x1] sm:$0xff]  ;;  %1781 = vmatpush3.bf16.msra.mxu1 %v2288_v17  ;;  %1801 = vmatpush3.bf16.msra.mxu0 %v2286_v15  ;;  %v1814_v49 = vpack.c.bf16 %v272_v47, %v271_v46  ;;  %v370_v51 = vld [vmem:[#allocation9 + $0x28] sm:$0xff]  ;;  %v373_v1 = vld [vmem:[#allocation9 + $0x40] sm:$0xff] }
  0x43   :  { %v73_v29 = vld [vmem:[#allocation2] sm:$0xff]  ;;  %1485 = vmatprep.mubr.msk.f32.mxu0 %vm69_vm1, %v172_v28  ;;  %1803 = vmatprep.subr.bf16.mxu0 %v2296_v22  ;;  %v74_v36 = vld [vmem:[#allocation2 + $0x8] sm:$0xff]  ;;  %v2332_v54 = vpack.c.bf16 %v370_v51, %v369_v50  ;;  %v374_v2 = vld [vmem:[#allocation9 + $0x48] sm:$0xff] }
  0x44   :  { %1783 = vmatprep.subr.bf16.mxu1 %v2298_v23  ;;  %v265_v37 = vld [vmem:[#allocation2 + $0x2] sm:$0xff]  ;;  %1466 = vmatprep.mubr.msk.f32.mxu1 %vm69_vm1, %v73_v29  ;;  %v266_v40 = vld [vmem:[#allocation2 + $0xa] sm:$0xff]  ;;  %v2368_v3 = vpack.c.bf16 %v374_v2, %v373_v1  ;;  %v378_v8 = vld [vmem:[#allocation9 + $0x68] sm:$0xff] }
  0x45   :  { %v173_v39 = vld [vmem:[#allocation2 + $0x9] sm:$0xff]  ;;  %660 = vst.msk [vmem:[#allocation2 + $0x1] sm:$0xff] %vm69_vm1, %v658_v30  ;;  %v371_v56 = vld [vmem:[#allocation9 + $0x30] sm:$0xff]  ;;  %v467_v14 = vld [vmem:[#allocation9 + $0x88] sm:$0xff] }
  0x46   :  { %1785 = vmatpush3.bf16.msra.mxu1 %v2298_v23  ;;  %661 = vst.msk [vmem:[#allocation2 + $0x9] sm:$0xff] %vm69_vm1, %v659_v34  ;;  %1805 = vmatpush3.bf16.msra.mxu0 %v2296_v22  ;;  %v274_v53 = vld [vmem:[#allocation7 + $0xb8] sm:$0xff]  ;;  %v377_v7 = vld [vmem:[#allocation9 + $0x60] sm:$0xff]  ;;  %v379_v10 = vld [vmem:[#allocation9 + $0x70] sm:$0xff] }
  0x47   :  { %1787 = vmatprep.subr.bf16.mxu1 %v2303_v33  ;;  %1807 = vmatprep.subr.bf16.mxu0 %v2306_v35  ;;  %v1818_v55 = vpack.c.bf16 %v274_v53, %v273_v52  ;;  %v372_v57 = vld [vmem:[#allocation9 + $0x38] sm:$0xff]  ;;  %v2376_v9 = vpack.c.bf16 %v378_v8, %v377_v7  ;;  %v466_v13 = vld [vmem:[#allocation9 + $0x80] sm:$0xff]  ;;  %v468_v16 = vld [vmem:[#allocation9 + $0x90] sm:$0xff] }
  0x48   :  { %v2336_v58 = vpack.c.bf16 %v372_v57, %v371_v56  ;;  %v376_v5 = vld [vmem:[#allocation9 + $0x58] sm:$0xff]  ;;  %v470_v19 = vld [vmem:[#allocation9 + $0xa0] sm:$0xff]  ;;  %v471_v20 = vld [vmem:[#allocation9 + $0xa8] sm:$0xff] }
  0x49   :  { %1486 = vmatmul.mubr.msk.f32.vlgmr.msra.gmra.mrb[0].mxu0 %vm69_vm1, %v173_v39  ;;  %v380_v11 = vld [vmem:[#allocation9 + $0x78] sm:$0xff]  ;;  %v1862_v21 = vpack.c.bf16 %v471_v20, %v470_v19  ;;  %v474_v25 = vld [vmem:[#allocation9 + $0xc0] sm:$0xff]  ;;  %v475_v26 = vld [vmem:[#allocation9 + $0xc8] sm:$0xff] }
  0x4a   :  { %1789 = vmatpush3.bf16.msra.mxu1 %v2303_v33  ;;  %1809 = vmatpush3.bf16.msra.mxu0 %v2306_v35  ;;  %v1870_v27 = vpack.c.bf16 %v475_v26, %v474_v25  ;;  %v476_v28 = vld [vmem:[#allocation9 + $0xd0] sm:$0xff]  ;;  %v477_v29 = vld [vmem:[#allocation9 + $0xd8] sm:$0xff]  ;;  %v478_v31 = vld [vmem:[#allocation9 + $0xe0] sm:$0xff] }
  0x4b   :  { %1504 = vmatprep.mubr.msk.f32.mxu0 %vm69_vm1, %v265_v37  ;;  %1811 = vmatprep.subr.bf16.mxu0 %v2316_v42  ;;  %v1874_v30 = vpack.c.bf16 %v477_v29, %v476_v28  ;;  %v479_v32 = vld [vmem:[#allocation9 + $0xe8] sm:$0xff]  ;;  %v480_v34 = vld [vmem:[#allocation9 + $0xf0] sm:$0xff]  ;;  %v561_v37 = vld [vmem:[#allocation9 + $0x100] sm:$0xff] }
  0x4c   :  { %1823 = vmatprep.subr.bf16.mxu1 %v2318_v43  ;;  %v663_v59 = vld [vmem:[#allocation2] sm:$0xff]  ;;  %v562_v38 = vld [vmem:[#allocation9 + $0x108] sm:$0xff]  ;;  %v564_v57 = vld [vmem:[#allocation9 + $0x118] sm:$0xff] }
  0x4d   :  { %1467 = vmatmul.mubr.msk.f32.vlgmr.msra.gmra.mrb[0].mxu1 %vm69_vm1, %v74_v36  ;;  %v664_v60 = vld [vmem:[#allocation2 + $0x8] sm:$0xff]  ;;  %v2384_v39 = vpack.c.bf16 %v562_v38, %v561_v37  ;;  %v563_v56 = vld [vmem:[#allocation9 + $0x110] sm:$0xff] }
  0x4e   :  { %1825 = vmatpush3.bf16.msra.mxu1 %v2318_v43  ;;  %1813 = vmatpush3.bf16.msra.mxu0 %v2316_v42  ;;  %v762_v61 = vld [vmem:[#allocation2 + $0x1] sm:$0xff]  ;;  %v763_v62 = vld [vmem:[#allocation2 + $0x9] sm:$0xff] }
  0x4f   :  { %1827 = vmatprep.subr.bf16.mxu1 %v2324_v48  ;;  %1815 = vmatprep.subr.bf16.mxu0 %v1814_v49  ;;  %v855_v63 = vld [vmem:[#allocation2 + $0x2] sm:$0xff]  ;;  %v856_v0 = vld [vmem:[#allocation2 + $0xa] sm:$0xff] }
  0x50   :  { %v568_v7 = vld [vmem:[#allocation9 + $0x138] sm:$0xff] }
  0x51   :  { %v576_v25 = vld [vmem:[#allocation9 + $0x178] sm:$0xff] }
  0x52   :  { %1829 = vmatpush3.bf16.msra.mxu1 %v2324_v48  ;;  %1817 = vmatpush3.bf16.msra.mxu0 %v1814_v49 }
  0x53   :  { %1831 = vmatprep.subr.bf16.mxu1 %v2332_v54  ;;  %1819 = vmatprep.subr.bf16.mxu0 %v1818_v55 }
  0x56   :  { %1833 = vmatpush3.bf16.msra.mxu1 %v2332_v54  ;;  %1821 = vmatpush3.bf16.msra.mxu0 %v1818_v55 }
  0x57   :  { %1835 = vmatprep.subr.bf16.mxu1 %v2336_v58  ;;  %1919 = vmatprep.subr.bf16.mxu0 %v2282_v12 }
  0x59   :  { %1505 = vmatmul.mubr.msk.f32.vlgmr.msra.gmra.mrb[0].mxu0 %vm69_vm1, %v266_v40 }
  0x5a   :  { %1837 = vmatpush3.bf16.msra.mxu1 %v2336_v58  ;;  %1921 = vmatpush3.bf16.msra.mxu0 %v2282_v12  ;;  %v2380_v12 = vpack.c.bf16 %v380_v11, %v379_v10 }
  0x5b   :  { %1628 = vmatprep.mubr.msk.f32.mxu0 %vm69_vm1, %v663_v59  ;;  %1923 = vmatprep.subr.bf16.mxu0 %v2288_v17  ;;  %v1890_v59 = vpack.c.bf16 %v564_v57, %v563_v56 }
  0x5c   :  { %1839 = vmatprep.subr.bf16.mxu1 %v2368_v3 }
  0x5e   :  { %1925 = vmatpush3.bf16.msra.mxu0 %v2288_v17  ;;  %1841 = vmatpush3.bf16.msra.mxu1 %v2368_v3  ;;  %v469_v17 = vld [vmem:[#allocation9 + $0x98] sm:$0xff] }
  0x5f   :  { %1927 = vmatprep.subr.bf16.mxu0 %v2298_v23  ;;  %v1858_v18 = vpack.c.bf16 %v469_v17, %v468_v16  ;;  %v571_v17 = vld [vmem:[#allocation9 + $0x150] sm:$0xff] }
  0x62   :  { %1929 = vmatpush3.bf16.msra.mxu0 %v2298_v23  ;;  %v473_v23 = vld [vmem:[#allocation9 + $0xb8] sm:$0xff] }
  0x63   :  { %1931 = vmatprep.subr.bf16.mxu0 %v2303_v33 }
  0x66   :  { %1933 = vmatpush3.bf16.msra.mxu0 %v2303_v33  ;;  %v1878_v33 = vpack.c.bf16 %v479_v32, %v478_v31 }
  0x67   :  { %1935 = vmatprep.subr.bf16.mxu0 %v2276_v4 }
  0x69   :  { %1629 = vmatmul.mubr.msk.f32.vlgmr.msra.gmra.mrb[2].mxu0 %vm69_vm1, %v664_v60  ;;  %v565_v60 = vld [vmem:[#allocation9 + $0x120] sm:$0xff] }
  0x6a   :  { %1937 = vmatpush3.bf16.msra.mxu0 %v2276_v4  ;;  %1647 = vmatprep.mubr.msk.f32.mxu0 %vm69_vm1, %v762_v61  ;;  %v375_v4 = vld [vmem:[#allocation9 + $0x50] sm:$0xff]  ;;  %v566_v61 = vld [vmem:[#allocation9 + $0x128] sm:$0xff] }
  0x6b   :  { %1939 = vmatprep.subr.bf16.mxu0 %v2278_v6  ;;  %v1894_v2 = vpack.c.bf16 %v566_v61, %v565_v60 }
  0x6e   :  { %1941 = vmatpush3.bf16.msra.mxu0 %v2278_v6  ;;  %v2372_v6 = vpack.c.bf16 %v376_v5, %v375_v4  ;;  %v567_v5 = vld [vmem:[#allocation9 + $0x130] sm:$0xff] }
  0x6f   :  { %1943 = vmatprep.subr.bf16.mxu0 %v2286_v15 }
  0x70   :  { %1843 = vmatprep.subr.bf16.mxu1 %v2372_v6 }
  0x71   :  { %1845 = vmatpush3.bf16.msra.mxu1 %v2372_v6 }
  0x72   :  { %1945 = vmatpush3.bf16.msra.mxu0 %v2286_v15  ;;  %1847 = vmatprep.subr.bf16.mxu1 %v2376_v9  ;;  %v1854_v15 = vpack.c.bf16 %v467_v14, %v466_v13  ;;  %v1898_v13 = vpack.c.bf16 %v568_v7, %v567_v5  ;;  %v569_v14 = vld [vmem:[#allocation9 + $0x140] sm:$0xff] }
  0x73   :  { %1947 = vmatprep.subr.bf16.mxu0 %v2296_v22 }
  0x75   :  { %1849 = vmatpush3.bf16.msra.mxu1 %v2376_v9 }
  0x76   :  { %1949 = vmatpush3.bf16.msra.mxu0 %v2296_v22  ;;  %1851 = vmatprep.subr.bf16.mxu1 %v2380_v12  ;;  %v472_v22 = vld [vmem:[#allocation9 + $0xb0] sm:$0xff] }
  0x77   :  { %1951 = vmatprep.subr.bf16.mxu0 %v2306_v35  ;;  %v1866_v24 = vpack.c.bf16 %v473_v23, %v472_v22  ;;  %v574_v22 = vld [vmem:[#allocation9 + $0x168] sm:$0xff] }
  0x79   :  { %1648 = vmatmul.mubr.msk.f32.vlgmr.msra.gmra.mrb[2].mxu0 %vm69_vm1, %v763_v62  ;;  %1853 = vmatpush3.bf16.msra.mxu1 %v2380_v12 }
  0x7a   :  { %1953 = vmatpush3.bf16.msra.mxu0 %v2306_v35  ;;  %1666 = vmatprep.mubr.msk.f32.mxu0 %vm69_vm1, %v855_v63  ;;  %v481_v35 = vld [vmem:[#allocation9 + $0xf8] sm:$0xff] }
  0x7b   :  { %1955 = vmatprep.subr.bf16.mxu0 %v2316_v42  ;;  %1855 = vmatprep.subr.bf16.mxu1 %v1854_v15  ;;  %v1882_v36 = vpack.c.bf16 %v481_v35, %v480_v34 }
  0x7e   :  { %1957 = vmatpush3.bf16.msra.mxu0 %v2316_v42  ;;  %v1268_v42 = vld [vmem:[%s2429_s2] ss:$0 sm:$0xff] }
  0x7f   :  { %1959 = vmatprep.subr.bf16.mxu0 %v1814_v49 }
  0x82   :  { %1961 = vmatpush3.bf16.msra.mxu0 %v1814_v49 }
  0x83   :  { %1963 = vmatprep.subr.bf16.mxu0 %v1818_v55 }
  0x86   :  { %1965 = vmatpush3.bf16.msra.mxu0 %v1818_v55 }
  0x87   :  { %1999 = vmatprep.subr.bf16.mxu0 %v1854_v15 }
  0x89   :  { %1667 = vmatmul.mubr.msk.f32.vlgmr.msra.gmra.mrb[2].mxu0 %vm69_vm1, %v856_v0 }
  0x8a   :  { %2001 = vmatpush3.bf16.msra.mxu0 %v1854_v15 }
  0x8b   :  { %2003 = vmatprep.subr.bf16.mxu0 %v1858_v18 }
  0x8e   :  { %2005 = vmatpush3.bf16.msra.mxu0 %v1858_v18 }
  0x8f   :  { %2007 = vmatprep.subr.bf16.mxu0 %v1862_v21 }
  0x92   :  { %2009 = vmatpush3.bf16.msra.mxu0 %v1862_v21 }
  0x93   :  { %2011 = vmatprep.subr.bf16.mxu0 %v1866_v24 }
  0x96   :  { %2013 = vmatpush3.bf16.msra.mxu0 %v1866_v24 }
  0x97   :  { %2015 = vmatprep.subr.bf16.mxu0 %v1870_v27 }
  0x9a   :  { %2017 = vmatpush3.bf16.msra.mxu0 %v1870_v27 }
  0x9b   :  { %2019 = vmatprep.subr.bf16.mxu0 %v1874_v30 }
  0x9e   :  { %2021 = vmatpush3.bf16.msra.mxu0 %v1874_v30 }
  0x9f   :  { %2023 = vmatprep.subr.bf16.mxu0 %v1878_v33 }
  0xa2   :  { %2025 = vmatpush3.bf16.msra.mxu0 %v1878_v33 }
  0xa3   :  { %2027 = vmatprep.subr.bf16.mxu0 %v1882_v36 }
  0xa6   :  { %2029 = vmatpush3.bf16.msra.mxu0 %v1882_v36 }
  0xa7   :  { %2031 = vmatprep.subr.bf16.mxu0 %v2384_v39 }
 0x120   :  { %v1468_v40 = vpop.f32.mrb[0].mxu1 }
 0x121   :  { %v155_v41 = vpop.f32.mrb[1].mxu1  ;;  %v171_v44 = vadd.f32 %v1468_v40, %v1268_v42 }
 0x122   :  { %v170_v45 = vadd.f32 %v1268_v42, %v155_v41 }
 0x12c   :  { %v1506_v46 = vpop.f32.mrb[0].mxu0 }
 0x12d   :  { %v2063_v47 = vadd.f32 %v1506_v46, %v171_v44  ;;  %v347_v49 = vpop.f32.mrb[1].mxu0 }
 0x12e   :  { %v2065_v50 = vadd.f32 %v347_v49, %v170_v45 }
 0x12f   :  { %v359_v51 = vmax.f32 %v2063_v47, 0.0 }
 0x130   :  { %v358_v52 = vmax.f32 %v2065_v50, 0.0 }
 0x131   :  { %361 = vst [vmem:[#allocation3 + $0x9] sm:$0xff] %v359_v51 }
 0x132   :  { %360 = vst [vmem:[#allocation3 + $0x1] sm:$0xff] %v358_v52 }
 0x138   :  { %v560_v10 = vld [vmem:[#allocation3 + $0xa] sm:$0xff] }
 0x139   :  { %v363_v53 = vld [vmem:[#allocation3] sm:$0xff]  ;;  %v364_v55 = vld [vmem:[#allocation3 + $0x8] sm:$0xff] }
 0x13a   :  { %1539 = vmatprep.mubr.f32.mxu1 %v363_v53  ;;  %v559_v62 = vld [vmem:[#allocation3 + $0x2] sm:$0xff] }
 0x13b   :  { %1540 = vmatmul.mubr.f32.vlgmr.msra.gmra.mrb[2].mxu1 %v364_v55 }
 0x13c   :  { %1857 = vmatpush3.bf16.msra.mxu1 %v1854_v15  ;;  %1574 = vmatprep.mubr.f32.mxu1 %v358_v52  ;;  %v570_v15 = vld [vmem:[#allocation9 + $0x148] sm:$0xff] }
 0x13d   :  { %1859 = vmatprep.subr.bf16.mxu1 %v1858_v18  ;;  %v1902_v16 = vpack.c.bf16 %v570_v15, %v569_v14 }
 0x140   :  { %1861 = vmatpush3.bf16.msra.mxu1 %v1858_v18  ;;  %v572_v18 = vld [vmem:[#allocation9 + $0x158] sm:$0xff] }
 0x141   :  { %1863 = vmatprep.subr.bf16.mxu1 %v1862_v21  ;;  %v1906_v20 = vpack.c.bf16 %v572_v18, %v571_v17 }
 0x144   :  { %1865 = vmatpush3.bf16.msra.mxu1 %v1862_v21  ;;  %v573_v21 = vld [vmem:[#allocation9 + $0x160] sm:$0xff] }
 0x145   :  { %1867 = vmatprep.subr.bf16.mxu1 %v1866_v24  ;;  %v1910_v23 = vpack.c.bf16 %v574_v22, %v573_v21 }
 0x148   :  { %1869 = vmatpush3.bf16.msra.mxu1 %v1866_v24  ;;  %v575_v24 = vld [vmem:[#allocation9 + $0x170] sm:$0xff] }
 0x149   :  { %1871 = vmatprep.subr.bf16.mxu1 %v1870_v27  ;;  %v1914_v26 = vpack.c.bf16 %v576_v25, %v575_v24 }
 0x14c   :  { %1873 = vmatpush3.bf16.msra.mxu1 %v1870_v27 }
 0x14d   :  { %1875 = vmatprep.subr.bf16.mxu1 %v1874_v30 }
 0x150   :  { %1877 = vmatpush3.bf16.msra.mxu1 %v1874_v30 }
 0x151   :  { %1879 = vmatprep.subr.bf16.mxu1 %v1878_v33 }
 0x154   :  { %1881 = vmatpush3.bf16.msra.mxu1 %v1878_v33 }
 0x155   :  { %1883 = vmatprep.subr.bf16.mxu1 %v1882_v36 }
 0x158   :  { %1885 = vmatpush3.bf16.msra.mxu1 %v1882_v36 }
 0x159   :  { %1887 = vmatprep.subr.bf16.mxu1 %v2384_v39 }
 0x15b   :  { %1575 = vmatmul.mubr.f32.vlgmr.msra.gmra.mrb[2].mxu1 %v359_v51 }
 0x15c   :  { %1889 = vmatpush3.bf16.msra.mxu1 %v2384_v39  ;;  %1609 = vmatprep.mubr.f32.mxu1 %v559_v62  ;;  %v1668_v63 = vpop.f32.mrb[2].mxu0 }
 0x15d   :  { %v2068_v0 = vadd.f32 %v1668_v63, %v1268_v42  ;;  %v937_v1 = vpop.f32.mrb[3].mxu0  ;;  %1891 = vmatprep.subr.bf16.mxu1 %v1890_v59 }
 0x15e   :  { %v2069_v4 = vadd.f32 %v1268_v42, %v937_v1 }
 0x15f   :  { %v949_v8 = vmax.f32 %v2068_v0, 0.0 }
 0x160   :  { %v948_v11 = vmax.f32 %v2069_v4, 0.0  ;;  %1893 = vmatpush3.bf16.msra.mxu1 %v1890_v59 }
 0x161   :  { %951 = vst [vmem:[#allocation3 + $0x9] sm:$0xff] %v949_v8  ;;  %1895 = vmatprep.subr.bf16.mxu1 %v1894_v2 }
 0x162   :  { %950 = vst [vmem:[#allocation3 + $0x1] sm:$0xff] %v948_v11  ;;  %1736 = vmatprep.mubr.f32.mxu0 %v948_v11 }
 0x163   :  { %1737 = vmatmul.mubr.f32.vlgmr.msra.gmra.mrb[4].mxu0 %v949_v8 }
 0x164   :  { %1897 = vmatpush3.bf16.msra.mxu1 %v1894_v2  ;;  %2033 = vmatpush3.bf16.msra.mxu0 %v2384_v39 }
 0x165   :  { %1899 = vmatprep.subr.bf16.mxu1 %v1898_v13  ;;  %2035 = vmatprep.subr.bf16.mxu0 %v1890_v59 }
 0x168   :  { %1901 = vmatpush3.bf16.msra.mxu1 %v1898_v13  ;;  %2037 = vmatpush3.bf16.msra.mxu0 %v1890_v59  ;;  %v1150_v28 = vld [vmem:[#allocation3 + $0xa] sm:$0xff] }
 0x169   :  { %1903 = vmatprep.subr.bf16.mxu1 %v1902_v16  ;;  %v1149_v19 = vld [vmem:[#allocation3 + $0x2] sm:$0xff]  ;;  %2039 = vmatprep.subr.bf16.mxu0 %v1894_v2 }
 0x16a   :  { %1771 = vmatprep.mubr.f32.mxu0 %v1149_v19  ;;  %v953_v27 = vld [vmem:[#allocation3] sm:$0xff] }
 0x16c   :  { %1905 = vmatpush3.bf16.msra.mxu1 %v1902_v16  ;;  %2041 = vmatpush3.bf16.msra.mxu0 %v1894_v2 }
 0x16d   :  { %1907 = vmatprep.subr.bf16.mxu1 %v1906_v20  ;;  %2043 = vmatprep.subr.bf16.mxu0 %v1898_v13 }
 0x170   :  { %1909 = vmatpush3.bf16.msra.mxu1 %v1906_v20  ;;  %2045 = vmatpush3.bf16.msra.mxu0 %v1898_v13 }
 0x171   :  { %1911 = vmatprep.subr.bf16.mxu1 %v1910_v23  ;;  %2047 = vmatprep.subr.bf16.mxu0 %v1902_v16 }
 0x174   :  { %1913 = vmatpush3.bf16.msra.mxu1 %v1910_v23  ;;  %2049 = vmatpush3.bf16.msra.mxu0 %v1902_v16 }
 0x175   :  { %1915 = vmatprep.subr.bf16.mxu1 %v1914_v26  ;;  %2051 = vmatprep.subr.bf16.mxu0 %v1906_v20 }
 0x178   :  { %1917 = vmatpush3.bf16.msra.mxu1 %v1914_v26  ;;  %2053 = vmatpush3.bf16.msra.mxu0 %v1906_v20 }
 0x179   :  { %1967 = vmatprep.subr.bf16.mxu1 %v2318_v43  ;;  %2055 = vmatprep.subr.bf16.mxu0 %v1910_v23 }
 0x17b   :  { %1610 = vmatmul.mubr.f32.vlgmr.msra.gmra.mrb[2].mxu1 %v560_v10 }
 0x17c   :  { %1969 = vmatpush3.bf16.msra.mxu1 %v2318_v43  ;;  %1701 = vmatprep.mubr.f32.mxu1 %v953_v27  ;;  %v954_v43 = vld [vmem:[#allocation3 + $0x8] sm:$0xff] }
 0x17d   :  { %1971 = vmatprep.subr.bf16.mxu1 %v2324_v48  ;;  %2057 = vmatpush3.bf16.msra.mxu0 %v1910_v23 }
 0x17e   :  { %2059 = vmatprep.subr.bf16.mxu0 %v1914_v26 }
 0x180   :  { %1973 = vmatpush3.bf16.msra.mxu1 %v2324_v48  ;;  %v1273_v48 = vld [vmem:[%s2431_s4] ss:$0 sm:$0xff]  ;;  %s2159_s4 = scalar_lea.vmem %s1254_s9, 512 }
 0x181   :  { %1975 = vmatprep.subr.bf16.mxu1 %v2332_v54  ;;  %2061 = vmatpush3.bf16.msra.mxu0 %v1914_v26  ;;  %p2160_p10 = scmp.ne.s32.totalorder %s1254_s9, %s2159_s4  ;;  %p2165_p12 = scmp.lt.s32.totalorder %s2159_s4, %s2159_s4 }
 0x183   :  { %p2166_p13 = por %p2165_p12, %p2164_p11 }
 0x184   :  { %1977 = vmatpush3.bf16.msra.mxu1 %v2332_v54  ;;  %1772 = vmatmul.mubr.f32.vlgmr.msra.gmra.mrb[4].mxu0 %v1150_v28 }
 0x185   :  { %1979 = vmatprep.subr.bf16.mxu1 %v2336_v58  ;;  %p2167_p0 = pnand %p2166_p13, %p2160_p10 }
 0x188   :  { %1981 = vmatpush3.bf16.msra.mxu1 %v2336_v58 }
 0x189   :  { %1983 = vmatprep.subr.bf16.mxu1 %v2368_v3 }
 0x18c   :  { %1985 = vmatpush3.bf16.msra.mxu1 %v2368_v3 }
 0x18d   :  { %1987 = vmatprep.subr.bf16.mxu1 %v2372_v6 }
 0x190   :  { %1989 = vmatpush3.bf16.msra.mxu1 %v2372_v6 }
 0x191   :  { %1991 = vmatprep.subr.bf16.mxu1 %v2376_v9 }
 0x194   :  { %1993 = vmatpush3.bf16.msra.mxu1 %v2376_v9 }
 0x195   :  { %1995 = vmatprep.subr.bf16.mxu1 %v2380_v12 }
 0x198   :  { %1997 = vmatpush3.bf16.msra.mxu1 %v2380_v12 }
 0x19b   :  { %1702 = vmatmul.mubr.f32.vlgmr.msra.gmra.mrb[4].mxu1 %v954_v43 }
 0x24e   :  { %v1611_v54 = vpop.f32.mrb[2].mxu1 }
 0x24f   :  { %v2066_v58 = vadd.f32 %v1611_v54, %v1273_v48  ;;  %v643_v3 = vpop.f32.mrb[3].mxu1 }
 0x250   :  { %v2067_v29 = vadd.f32 %v1273_v48, %v643_v3 }
 0x251   :  { %v655_v30 = vmax.f32 %v2066_v58, 0.0 }
 0x252   :  { %v654_v6 = vmax.f32 %v2067_v29, 0.0 }
 0x253   :  { %657 = vst [vmem:[#allocation10 + $0x8] sm:$0xff] %v655_v30 }
 0x254   :  { %656 = vst [vmem:[#allocation10] sm:$0xff] %v654_v6 }
 0x257   :  { %v1773_v31 = vpop.f32.mrb[4].mxu0 }
 0x258   :  { %v1233_v9 = vpop.f32.mrb[5].mxu0 }
 0x26e   :  { %v1703_v32 = vpop.f32.mrb[4].mxu1 }
 0x26f   :  { %v1053_v33 = vadd.f32 %v1703_v32, %v1273_v48  ;;  %v1037_v34 = vpop.f32.mrb[5].mxu1 }
 0x270   :  { %v1052_v12 = vadd.f32 %v1273_v48, %v1037_v34 }
 0x271   :  { %v2071_v35 = vadd.f32 %v1773_v31, %v1053_v33 }
 0x272   :  { %v2073_v36 = vadd.f32 %v1233_v9, %v1052_v12 }
 0x273   :  { %v1245_v37 = vmax.f32 %v2071_v35, 0.0 }
 0x274   :  { %v1244_v38 = vmax.f32 %v2073_v36, 0.0 }
 0x275   :  { %1247 = vst [vmem:[#allocation10 + $0x18] sm:$0xff] %v1245_v37 }
 0x276   :  { %1246 = vst [vmem:[#allocation10 + $0x10] sm:$0xff] %v1244_v38 }
 0x277   :  { %2170 = shalt.err (!%p2167_p0)
}
 0x278   :  { %s2171_s12 = scalar_lea.hbm %s2432_s5, 512 }
 0x279   :  { %p2172_p1 = scmp.ne.s32.totalorder %s2432_s5, %s2171_s12  ;;  %p2175_p2 = scmp.lt.u32.totalorder %s2171_s12, %s2432_s5 }
 0x27b   :  { %p2177_p3 = pnand %p2175_p2, %p2172_p1 }
 0x27d   :  { %2180 = shalt.err (!%p2177_p3)
}
 0x27e   :  { %1259 = dma.vmem_to_hbm [thread:$0]  %s1254_s9, 512, %s2432_s5, [#allocation6], %s2189_s30, %s2189_s30, %s2190_s6  }
 0x27f   :  { %2185 = dma.done.wait [#allocation6], 512  }
 0x280   :  { %2186 = vsyncadd [#allocation6], 4294966784 }
 0x281   :  { %1263 = vsyncpa [#allocation5], 1 }
 0x282   :  { %1264 = vsyncpa [#allocation8], 1 }
 0x283   :  { %1265 = vsyncpa [#allocation6], 1 }

</bundles_post_ra>
